<compile_context>
chip_gen: v5e
topology: v5e:2x2
jax: 0.10.0
libtpu: 0.0.40
codegen_flags: <defaults>
</compile_context>

<pallas_src>
import jax
import jax.numpy as jnp
from jax.experimental import pallas as pl
from jax.experimental.pallas import tpu as pltpu

# ---- model dims -------------------------------------------------------------
N_DOF = 4
HIDDEN_WIDTH = 32
HIDDEN_DEPTH = 3
N_TRIL = N_DOF * (N_DOF - 1) // 2
BIAS_INIT = 0.1

# ---- kernel layout constants ------------------------------------------------
LANES = 128            # every packed weight / activation / output is 128-lane wide

# row offsets inside the packed parameter slab (all 8-sublane aligned)
R_W0, R_B0 = 0, 8          # w0: rows [0,4)          b0: row 8
R_W1, R_B1 = 16, 144       # w1: rows [16,144)       b1: row 144
R_W2, R_B2 = 152, 280      # w2: rows [152,280)      b2: row 280
R_WH, R_BH = 288, 416      # fused head: [288,416)   bh: row 416
PACK_ROWS = 424            # multiple of 8

# column layout of the fused head / output slab
C_G = 0                    # [0, 4)   -> output_g
C_LD_SP = 4                # [4, 8)   -> softplus(output_L_diag)
C_LT = 8                   # [8, 14)  -> output_L_tril
C_LD_RAW = 14              # [14, 18) -> output_L_diag (raw)

BATCH = 256
TILE_M = 128


def intern_nn_kernel(q_ref, p_ref, out_ref):
    q = q_ref[...]                              # (TM, N_DOF)

    w0 = p_ref[R_W0:R_W0 + N_DOF, :]            # (4, 128)
    b0 = p_ref[R_B0:R_B0 + 1, :]                # (1, 128)
    w1 = p_ref[R_W1:R_W1 + LANES, :]            # (128, 128)
    b1 = p_ref[R_B1:R_B1 + 1, :]
    w2 = p_ref[R_W2:R_W2 + LANES, :]
    b2 = p_ref[R_B2:R_B2 + 1, :]
    wh = p_ref[R_WH:R_WH + LANES, :]            # fused head weight (128, 128)
    bh = p_ref[R_BH:R_BH + 1, :]

    # Hidden MLP: Linear -> ReLU -> Dropout(p=0, identity).  Padded lanes stay 0.
    h = jnp.maximum(jnp.dot(q, w0, preferred_element_type=jnp.float32) + b0, 0.0)
    h = jnp.maximum(jnp.dot(h, w1, preferred_element_type=jnp.float32) + b1, 0.0)
    h = jnp.maximum(jnp.dot(h, w2, preferred_element_type=jnp.float32) + b2, 0.0)

    # Single fused head matmul producing g | ld | tril | ld_raw | zeros.
    head = jnp.dot(h, wh, preferred_element_type=jnp.float32) + bh   # (TM, 128)

    # Softplus only on the L_diag activation lanes; everything else passes through.
    lane = jax.lax.broadcasted_iota(jnp.int32, head.shape, 1)
    is_diag = (lane >= C_LD_SP) & (lane < C_LD_SP + N_DOF)
    out_ref[...] = jnp.where(is_diag, jnp.logaddexp(head, 0.0), head)


def pack_params(p):
    """Pack all Linear weights/biases into one lane-dense (PACK_ROWS, 128) slab."""
    P = jnp.zeros((PACK_ROWS, LANES), dtype=jnp.float32)
    P = P.at[R_W0:R_W0 + N_DOF, 0:HIDDEN_WIDTH].set(p["w0"])
    P = P.at[R_B0, 0:HIDDEN_WIDTH].set(p["b0"][0])
    P = P.at[R_W1:R_W1 + HIDDEN_WIDTH, 0:HIDDEN_WIDTH].set(p["w1"])
    P = P.at[R_B1, 0:HIDDEN_WIDTH].set(p["b1"][0])
    P = P.at[R_W2:R_W2 + HIDDEN_WIDTH, 0:HIDDEN_WIDTH].set(p["w2"])
    P = P.at[R_B2, 0:HIDDEN_WIDTH].set(p["b2"][0])
    # Fused head: wg | wld (softplus slot) | wlt | wld (raw slot)
    P = P.at[R_WH:R_WH + HIDDEN_WIDTH, C_G:C_G + N_DOF].set(p["wg"])
    P = P.at[R_WH:R_WH + HIDDEN_WIDTH, C_LD_SP:C_LD_SP + N_DOF].set(p["wld"])
    P = P.at[R_WH:R_WH + HIDDEN_WIDTH, C_LT:C_LT + N_TRIL].set(p["wlt"])
    P = P.at[R_WH:R_WH + HIDDEN_WIDTH, C_LD_RAW:C_LD_RAW + N_DOF].set(p["wld"])
    P = P.at[R_BH, C_G:C_G + N_DOF].set(p["bg"][0])
    P = P.at[R_BH, C_LD_SP:C_LD_SP + N_DOF].set(p["bld"][0])
    P = P.at[R_BH, C_LT:C_LT + N_TRIL].set(p["blt"][0])
    P = P.at[R_BH, C_LD_RAW:C_LD_RAW + N_DOF].set(p["bld"][0])
    return P


def intern_nn_forward(q, params, *, tm=TILE_M):
    B = q.shape[0]
    packed = pack_params(params)

    grid_m = pl.cdiv(B, tm)
    b_pad = grid_m * tm
    if b_pad != B:                       # robust to batches not divisible by tm
        q = jnp.pad(q, ((0, b_pad - B), (0, 0)))

    out = pl.pallas_call(
        intern_nn_kernel,
        out_shape=jax.ShapeDtypeStruct((b_pad, LANES), jnp.float32),
        grid_spec=pltpu.PrefetchScalarGridSpec(
            num_scalar_prefetch=0,
            grid=(grid_m,),
            in_specs=[
                pl.BlockSpec((tm, N_DOF), lambda i: (i, 0)),
                pl.BlockSpec((PACK_ROWS, LANES), lambda i: (0, 0)),  # resident
            ],
            out_specs=pl.BlockSpec((tm, LANES), lambda i: (i, 0)),
        ),
        compiler_params=pltpu.CompilerParams(
            dimension_semantics=("parallel",)),
    )(q, packed)

    g = out[:B, C_G:C_G + N_DOF]
    ld_sp = out[:B, C_LD_SP:C_LD_SP + N_DOF]
    lt = out[:B, C_LT:C_LT + N_TRIL]
    ld_raw = out[:B, C_LD_RAW:C_LD_RAW + N_DOF]
    return g, ld_sp, lt, ld_raw


# ---- parameter init (xavier_normal weights, constant 0.1 bias) ---------------
def _xavier_normal(key, fan_in, fan_out):
    std = jnp.sqrt(2.0 / (fan_in + fan_out)).astype(jnp.float32)
    return std * jax.random.normal(key, (fan_in, fan_out), dtype=jnp.float32)


def init_params(key):
    keys = jax.random.split(key, 6)
    bias = lambda n: jnp.full((1, n), BIAS_INIT, dtype=jnp.float32)
    return {
        "w0": _xavier_normal(keys[0], N_DOF, HIDDEN_WIDTH), "b0": bias(HIDDEN_WIDTH),
        "w1": _xavier_normal(keys[1], HIDDEN_WIDTH, HIDDEN_WIDTH), "b1": bias(HIDDEN_WIDTH),
        "w2": _xavier_normal(keys[2], HIDDEN_WIDTH, HIDDEN_WIDTH), "b2": bias(HIDDEN_WIDTH),
        "wg": _xavier_normal(keys[3], HIDDEN_WIDTH, N_DOF), "bg": bias(N_DOF),
        "wld": _xavier_normal(keys[4], HIDDEN_WIDTH, N_DOF), "bld": bias(N_DOF),
        "wlt": _xavier_normal(keys[5], HIDDEN_WIDTH, N_TRIL), "blt": bias(N_TRIL),
    }


def reference_forward(q, p):
    h = q
    for w, b in (("w0", "b0"), ("w1", "b1"), ("w2", "b2")):
        h = jnp.maximum(h @ p[w] + p[b], 0.0)
    g = h @ p["wg"] + p["bg"]
    ld = h @ p["wld"] + p["bld"]
    lt = h @ p["wlt"] + p["blt"]
    return g, jnp.logaddexp(ld, 0.0), lt, ld


if __name__ == "__main__":
    key = jax.random.PRNGKey(0)
    k_param, k_q = jax.random.split(key)
    params = init_params(k_param)
    q = jax.random.normal(k_q, (BATCH, N_DOF), dtype=jnp.float32)

    outs = intern_nn_forward(q, params)
    outs = jax.block_until_ready(outs)

    refs = reference_forward(q, params)
    for o, r in zip(outs, refs):
        assert o.shape == r.shape and o.dtype == r.dtype
        assert jnp.allclose(o, r, atol=1e-4, rtol=1e-4)

    print("KERNEL_OK")
</pallas_src>

<mosaic_0001>
module attributes {stable_mosaic.version = 11 : i64} {
  func.func @intern_nn_kernel(%arg0: i32, %arg1: memref<128x4xf32, #tpu.memory_space<vmem>>, %arg2: memref<424x128xf32, #tpu.memory_space<vmem>>, %arg3: memref<128x128xf32, #tpu.memory_space<vmem>>) attributes {dimension_semantics = [#tpu.dimension_semantics<parallel>], iteration_bounds = array<i64: 2>, scalar_prefetch = 0 : i64, scratch_operands = 0 : i64, tpu.core_type = #tpu.core_type<tc>, window_params = [{transform_indices = @transform_0, window_bounds = array<i64: 128, 4>}, {pipeline_mode = #tpu.pipeline_mode<synchronous>, transform_indices = @transform_1, window_bounds = array<i64: 424, 128>}, {transform_indices = @transform_2, window_bounds = array<i64: 128, 128>}]} {
    %c0 = arith.constant 0 : index
    %c0_0 = arith.constant 0 : index
    %0 = vector.load %arg1[%c0, %c0_0] : memref<128x4xf32, #tpu.memory_space<vmem>>, vector<128x4xf32>
    %c0_1 = arith.constant 0 : index
    %c0_2 = arith.constant 0 : index
    %1 = vector.load %arg2[%c0_1, %c0_2] : memref<424x128xf32, #tpu.memory_space<vmem>>, vector<4x128xf32>
    %c8 = arith.constant 8 : index
    %c0_3 = arith.constant 0 : index
    %2 = vector.load %arg2[%c8, %c0_3] : memref<424x128xf32, #tpu.memory_space<vmem>>, vector<1x128xf32>
    %c16 = arith.constant 16 : index
    %c0_4 = arith.constant 0 : index
    %3 = vector.load %arg2[%c16, %c0_4] : memref<424x128xf32, #tpu.memory_space<vmem>>, vector<128x128xf32>
    %c144 = arith.constant 144 : index
    %c0_5 = arith.constant 0 : index
    %4 = vector.load %arg2[%c144, %c0_5] : memref<424x128xf32, #tpu.memory_space<vmem>>, vector<1x128xf32>
    %c152 = arith.constant 152 : index
    %c0_6 = arith.constant 0 : index
    %5 = vector.load %arg2[%c152, %c0_6] : memref<424x128xf32, #tpu.memory_space<vmem>>, vector<128x128xf32>
    %c280 = arith.constant 280 : index
    %c0_7 = arith.constant 0 : index
    %6 = vector.load %arg2[%c280, %c0_7] : memref<424x128xf32, #tpu.memory_space<vmem>>, vector<1x128xf32>
    %c288 = arith.constant 288 : index
    %c0_8 = arith.constant 0 : index
    %7 = vector.load %arg2[%c288, %c0_8] : memref<424x128xf32, #tpu.memory_space<vmem>>, vector<128x128xf32>
    %c416 = arith.constant 416 : index
    %c0_9 = arith.constant 0 : index
    %8 = vector.load %arg2[%c416, %c0_9] : memref<424x128xf32, #tpu.memory_space<vmem>>, vector<1x128xf32>
    %cst = arith.constant dense<0.000000e+00> : vector<128x128xf32>
    %9 = tpu.matmul %0, %1, %cst {dimension_numbers = #tpu.dot_dimension_numbers<[1], [0], [0], [1], [0, 0, 1, 1], [], []>} : vector<128x4xf32>, vector<4x128xf32>, vector<128x128xf32> -> vector<128x128xf32>
    %10 = vector.broadcast %2 : vector<1x128xf32> to vector<128x128xf32>
    %11 = arith.addf %9, %10 : vector<128x128xf32>
    %cst_10 = arith.constant 0.000000e+00 : f32
    %12 = vector.broadcast %cst_10 : f32 to vector<128x128xf32>
    %13 = arith.maximumf %11, %12 : vector<128x128xf32>
    %cst_11 = arith.constant dense<0.000000e+00> : vector<128x128xf32>
    %14 = tpu.matmul %13, %3, %cst_11 {dimension_numbers = #tpu.dot_dimension_numbers<[1], [0], [0], [1], [0, 0, 1, 1], [], []>} : vector<128x128xf32>, vector<128x128xf32>, vector<128x128xf32> -> vector<128x128xf32>
    %15 = vector.broadcast %4 : vector<1x128xf32> to vector<128x128xf32>
    %16 = arith.addf %14, %15 : vector<128x128xf32>
    %cst_12 = arith.constant 0.000000e+00 : f32
    %17 = vector.broadcast %cst_12 : f32 to vector<128x128xf32>
    %18 = arith.maximumf %16, %17 : vector<128x128xf32>
    %cst_13 = arith.constant dense<0.000000e+00> : vector<128x128xf32>
    %19 = tpu.matmul %18, %5, %cst_13 {dimension_numbers = #tpu.dot_dimension_numbers<[1], [0], [0], [1], [0, 0, 1, 1], [], []>} : vector<128x128xf32>, vector<128x128xf32>, vector<128x128xf32> -> vector<128x128xf32>
    %20 = vector.broadcast %6 : vector<1x128xf32> to vector<128x128xf32>
    %21 = arith.addf %19, %20 : vector<128x128xf32>
    %cst_14 = arith.constant 0.000000e+00 : f32
    %22 = vector.broadcast %cst_14 : f32 to vector<128x128xf32>
    %23 = arith.maximumf %21, %22 : vector<128x128xf32>
    %cst_15 = arith.constant dense<0.000000e+00> : vector<128x128xf32>
    %24 = tpu.matmul %23, %7, %cst_15 {dimension_numbers = #tpu.dot_dimension_numbers<[1], [0], [0], [1], [0, 0, 1, 1], [], []>} : vector<128x128xf32>, vector<128x128xf32>, vector<128x128xf32> -> vector<128x128xf32>
    %25 = vector.broadcast %8 : vector<1x128xf32> to vector<128x128xf32>
    %26 = arith.addf %24, %25 : vector<128x128xf32>
    %27 = tpu.iota {dimensions = array<i32: 1>} : vector<128x128xi32>
    %c4_i32 = arith.constant 4 : i32
    %28 = vector.broadcast %c4_i32 : i32 to vector<128x128xi32>
    %29 = arith.cmpi sge, %27, %28 : vector<128x128xi32>
    %c8_i32 = arith.constant 8 : i32
    %30 = vector.broadcast %c8_i32 : i32 to vector<128x128xi32>
    %31 = arith.cmpi slt, %27, %30 : vector<128x128xi32>
    %32 = arith.andi %29, %31 : vector<128x128xi1>
    %cst_16 = arith.constant 0.000000e+00 : f32
    %33 = vector.broadcast %cst_16 : f32 to vector<128x128xf32>
    %34 = arith.maximumf %26, %33 : vector<128x128xf32>
    %35 = vector.broadcast %cst_16 : f32 to vector<128x128xf32>
    %36 = arith.subf %26, %35 : vector<128x128xf32>
    %37 = arith.cmpf one, %36, %36 : vector<128x128xf32>
    %38 = vector.broadcast %cst_16 : f32 to vector<128x128xf32>
    %39 = arith.addf %26, %38 : vector<128x128xf32>
    %40 = math.absf %36 : vector<128x128xf32>
    %cst_17 = arith.constant 0.000000e+00 : f32
    %41 = vector.broadcast %cst_17 : f32 to vector<128x128xf32>
    %42 = arith.subf %41, %40 : vector<128x128xf32>
    %43 = math.exp %42 : vector<128x128xf32>
    %44 = math.log1p %43 : vector<128x128xf32>
    %45 = arith.addf %34, %44 : vector<128x128xf32>
    %46 = arith.select %37, %39, %45 : vector<128x128xi1>, vector<128x128xf32>
    %47 = arith.select %32, %46, %26 : vector<128x128xi1>, vector<128x128xf32>
    %c0_18 = arith.constant 0 : index
    %c0_19 = arith.constant 0 : index
    %48 = vector.load %arg3[%c0_18, %c0_19] : memref<128x128xf32, #tpu.memory_space<vmem>>, vector<128x128xf32>
    tpu.vector_store %arg3[%c0_18, %c0_19], %47 {strides = array<i32>} : memref<128x128xf32, #tpu.memory_space<vmem>>, vector<128x128xf32>,
    return
  }
  func.func @transform_0(%arg0: i32) -> (i32, i32) {
    %c0_i32 = arith.constant 0 : i32
    %c0_i32_0 = arith.constant 0 : i32
    return %arg0, %c0_i32 : i32, i32
  }
  func.func @transform_1(%arg0: i32) -> (i32, i32) {
    %c0_i32 = arith.constant 0 : i32
    %c0_i32_0 = arith.constant 0 : i32
    %c0_i32_1 = arith.constant 0 : i32
    return %c0_i32, %c0_i32_0 : i32, i32
  }
  func.func @transform_2(%arg0: i32) -> (i32, i32) {
    %c0_i32 = arith.constant 0 : i32
    %c0_i32_0 = arith.constant 0 : i32
    return %arg0, %c0_i32 : i32, i32
  }
}

</mosaic_0001>

<bundles_post_ra>
// kernel: tpu_custom_call.1
= control target key start
LH: loop header
LB: loop body
LE: loop exit
PB: predicated region body
PF: predicated region fallthrough
CT: control target
= control target key end

     0   :  { %7 = vsyncpa [#allocation3], 0  ;;  %s1661_s0 = inlined_call_operand.vmem [shape: f32[256,4], index: 0, kind: input, shape index: {}]   ;;  %s1662_s1 = inlined_call_operand.hbm [shape: f32[424,128], index: 1, kind: input, shape index: {}]   ;;  %s1663_s2 = inlined_call_operand.hbm [shape: f32[256,128], index: 2, kind: output, shape index: {}]  }
   0x1   :  { %8 = vsyncpa [#allocation4], 0 }
   0x2   :  { %10 = vsyncpa [#allocation4 + $0x1], 0  ;;  %s1299_s9 = smov 0   ;;  %s1301_s10 = smov 0  }
   0x3   :  { %s1303_s11 = smov 0   ;;  %s1305_s12 = smov 0  }
   0x4 LB: > { %s1320_s13 = sadd.s32 4294967295, %s1277_s12   ;;  %s1011_s14 = sadd.s32 4294967294, %s1277_s12   ;;  %s1277_s12 = sphi %s1305_s12, %s1671_s12   ;;  %s1273_s11 = sphi %s1303_s11, %s1670_s11   ;;  %s1269_s10 = sphi %s1301_s10, %s1669_s10   ;;  %s1265_s9 = sphi %s1299_s9, %s1668_s9  }
   0x5   : > { %s1324_s15 = sadd.s32 1, %s1277_s12   ;;  %s70_s16 = sadd.s32 1, %s1273_s11 }
   0x6   : > { %s67_s17 = ssub.s32 %s1277_s12, %s1324_s15  ;;  %p80_p0 = scmp.ne.s32.totalorder %s1273_s11, %s1269_s10 }
   0x7   : > { %p68_p1 = scmp.eq.s32.totalorder %s67_s17, 0  ;;  %p81_p2 = scmp.eq.s32.totalorder %s1320_s13, 1 }
   0x8   : > { %p86_p3 = scmp.ne.s32.totalorder %s1269_s10, %s1265_s9  ;;  %p87_p4 = scmp.eq.s32.totalorder %s1011_s14, 1 }
   0x9   : > { %s1335_s18 = scalar_select %p68_p1, %s1273_s11, %s70_s16  }
   0xa   : > { %p1337_p5 = por %p81_p2, %p80_p0  ;;  %p1341_p6 = por %p87_p4, %p86_p3 }
   0xb   : > { %p1012_p7 = scmp.ge.s32.totalorder %s1277_s12, 1  ;;  %p94_p8 = scmp.lt.s32.totalorder %s1277_s12, 3 }
   0xc   : > { %p1073_p9 = scmp.eq.s32.totalorder %s1320_s13, 0  ;;  %s105_s23 = sshll.u32 %s1662_s1, 4  ;;  %s106_s23 = int_to_ptr.hbm [resolvable:$true] %s105_s23 }
   0xd   : > { %p95_p10 = pnand %p1012_p7, %p94_p8  ;;  %s1279_s24 = smov [#allocation2]  }
   0xe   : > { %s107_s25 = sshll.u32 %s1279_s24, 4  ;;  %s1280_s26 = smov 128   ;;  %s108_s25 = int_to_ptr.vmem [resolvable:$true] %s107_s25 }
   0xf   : > { %p1065_p11 = pneg %p95_p10  ;;  %s1281_s27 = smov 8  }
  0x10   : > { %132 = sbr.rel (%p95_p10) target bundleno = 712 (0x2c8), region = 28 }
  0x11   : > { %p1066_p12 = pnand %p1073_p9, %p1065_p11 }
  0x13   : > { %1068 = dma.hbm_to_vmem [thread:$0]  (!%p1066_p12), %s106_s23, 6784, %s108_s25, [#allocation3], %s1280_s26, %s1280_s26, %s1281_s27  }
  0x15   : > { %1256 = dma.done.wait (%p1073_p9), [#allocation3], 6784  }
  0x16   : > { %1258 = vsyncadd (%p1073_p9), [#allocation3], 4294960512  ;;  %s1018_s28 = sshll.u32 %s1320_s13, 4  ;;  %vm281_vm0 = vcmask 1043456   ;;  %vm232_vm1 = vcmask 31744   ;;  %v195_v2 = vld [vmem:[#allocation2 + $0x88] sm:$0xff] }
  0x17   : > { %p156_p13 = scmp.lt.s32.totalorder %s1018_s28, 31  ;;  %v178_v0 = vld [vmem:[#allocation2] sm:$0xf]  ;;  %1043 = vmatpush.msra.mxu1 %v195_v2  ;;  %v193_v4 = vld [vmem:[#allocation2 + $0x78] sm:$0xff]  ;;  %v192_v5 = vld [vmem:[#allocation2 + $0x70] sm:$0xff]  ;;  %s152_s5 = sand.u32 1, %s1269_s10  }
  0x18   : > { %1020 = vmatpush.msk.msra.mxu0 %vm281_vm0, %v178_v0  ;;  %v194_v3 = vld [vmem:[#allocation2 + $0x80] sm:$0xff]  ;;  %v191_v7 = vld [vmem:[#allocation2 + $0x68] sm:$0xff]  ;;  %v189_v10 = vld [vmem:[#allocation2 + $0x58] sm:$0xff]  ;;  %s1017_s6 = sshll.u32 %s152_s5, 7  ;;  %s1042_s8 = sshll.u32 %s1320_s13, 7 }
  0x19   : > { %s1673_s28 = smov (!%p156_p13, %s1018_s28), 31  ;;  %1044 = vmatpush.msra.mxu1 %v194_v3  ;;  %v190_v8 = vld [vmem:[#allocation2 + $0x60] sm:$0xff]  ;;  %v188_v12 = vld [vmem:[#allocation2 + $0x50] sm:$0xff]  ;;  %v187_v14 = vld [vmem:[#allocation2 + $0x48] sm:$0xff]  ;;  %s1456_s7 = scalar_lea.vmem [#allocation5], %s1017_s6 }
  0x1a   : > { %s1019_s29 = sshll.u32 %s1673_s28, 3  ;;  %367 = vmatpush.msrb.mxu0 %v195_v2  ;;  %v186_v16 = vld [vmem:[#allocation2 + $0x40] sm:$0xff]  ;;  %v185_v18 = vld [vmem:[#allocation2 + $0x38] sm:$0xff]  ;;  %v184_v20 = vld [vmem:[#allocation2 + $0x30] sm:$0xff]  ;;  %s933_s17 = scalar_lea.hbm %s1663_s2, %s1042_s8 }
  0x1b   : > { %s1361_s4 = scalar_lea.vmem %s1661_s0, %s1019_s29  ;;  %1045 = vmatpush.msra.mxu1 %v193_v4  ;;  %v183_v22 = vld [vmem:[#allocation2 + $0x28] sm:$0xff]  ;;  %v182_v24 = vld [vmem:[#allocation2 + $0x20] sm:$0xff]  ;;  %v181_v26 = vld [vmem:[#allocation2 + $0x18] sm:$0xff]  ;;  %s934_s13 = sshll.u32 %s1456_s7, 4  ;;  %s935_s13 = int_to_ptr.vmem [resolvable:$true] %s934_s13 }
  0x1c   : > { %v162_v1 = vld [vmem:[%s1361_s4] sm:$0xff]  ;;  %368 = vmatpush.msrb.mxu0 %v194_v3  ;;  %v163_v6 = vld [vmem:[%s1361_s4 + $0x8] sm:$0xff]  ;;  %v164_v9 = vld [vmem:[%s1361_s4 + $0x10] sm:$0xff]  ;;  %s936_s21 = sshll.u32 %s933_s17, 4  ;;  %s922_s22 = scalar_lea.sflag [#allocation4], %s152_s5  ;;  %s937_s21 = int_to_ptr.hbm [resolvable:$true] %s936_s21 }
  0x1d   : > { %1021 = vmatmul.msk.f32.vlgmr.msra.gmra.mxu0 %vm232_vm1, %v162_v1  ;;  %1046 = vmatpush.msra.mxu1 %v192_v5  ;;  %v165_v11 = vld [vmem:[%s1361_s4 + $0x18] sm:$0xff]  ;;  %v166_v13 = vld [vmem:[%s1361_s4 + $0x20] sm:$0xff]  ;;  %v167_v15 = vld [vmem:[%s1361_s4 + $0x28] sm:$0xff]  ;;  %s1225_s23 = sshra.s32 %s937_s21, 4  ;;  %s1231_s27 = scalar_lea.hbm %s1663_s2, 256  ;;  %s1226_s23 = int_to_ptr.hbm [resolvable:$true] %s1225_s23 }
  0x1e   : > { %369 = vmatpush.msrb.mxu0 %v193_v4  ;;  %v168_v17 = vld [vmem:[%s1361_s4 + $0x30] sm:$0xff]  ;;  %v169_v19 = vld [vmem:[%s1361_s4 + $0x38] sm:$0xff]  ;;  %v170_v21 = vld [vmem:[%s1361_s4 + $0x40] sm:$0xff]  ;;  %s1227_s24 = scalar_lea.hbm %s1226_s23, 128  ;;  %p1232_p3 = scmp.lt.s32.totalorder %s1226_s23, %s1663_s2 }
  0x1f   : > { %1047 = vmatpush.msra.mxu1 %v191_v7  ;;  %v171_v23 = vld [vmem:[%s1361_s4 + $0x48] sm:$0xff]  ;;  %v172_v25 = vld [vmem:[%s1361_s4 + $0x50] sm:$0xff]  ;;  %v173_v27 = vld [vmem:[%s1361_s4 + $0x58] sm:$0xff]  ;;  %p1228_p0 = scmp.ne.s32.totalorder %s1226_s23, %s1227_s24  ;;  %p1233_p4 = scmp.lt.s32.totalorder %s1231_s27, %s1227_s24 }
  0x20   : > { %370 = vmatpush.msrb.mxu0 %v192_v5  ;;  %v180_v28 = vld [vmem:[#allocation2 + $0x10] sm:$0xff]  ;;  %v174_v29 = vld [vmem:[%s1361_s4 + $0x60] sm:$0xff]  ;;  %v175_v30 = vld [vmem:[%s1361_s4 + $0x68] sm:$0xff] }
  0x21   : > { %1048 = vmatpush.msra.mxu1 %v190_v8  ;;  %v176_v31 = vld [vmem:[%s1361_s4 + $0x70] sm:$0xff]  ;;  %v177_v32 = vld [vmem:[%s1361_s4 + $0x78] sm:$0xff]  ;;  %v1395_v33 = vld [vmem:[#allocation2 + $0x8] ss:$0 sm:$0xff]  ;;  %p1229_p1 = pnand %p1228_p0, %p1337_p5  ;;  %p1234_p7 = por %p1233_p4, %p1232_p3 }
  0x22   : > { %371 = vmatpush.msrb.mxu0 %v191_v7  ;;  %v212_v61 = vld [vmem:[#allocation2 + $0x110] sm:$0xff]  ;;  %v211_v0 = vld [vmem:[#allocation2 + $0x108] sm:$0xff]  ;;  %v210_v2 = vld [vmem:[#allocation2 + $0x100] sm:$0xff] }
  0x23   : > { %1049 = vmatpush.msra.mxu1 %v189_v10  ;;  %449 = vmatpush.msra.mxu2 %v212_v61  ;;  %v209_v3 = vld [vmem:[#allocation2 + $0xf8] sm:$0xff]  ;;  %v208_v4 = vld [vmem:[#allocation2 + $0xf0] sm:$0xff]  ;;  %v207_v7 = vld [vmem:[#allocation2 + $0xe8] sm:$0xff]  ;;  %p1230_p2 = pneg %p1229_p1 }
  0x24   : > { %372 = vmatpush.msrb.mxu0 %v190_v8 }
  0x25   : > { %1022 = vmatmul.msk.f32.gmra.mxu0 %vm232_vm1, %v163_v6  ;;  %1050 = vmatpush.msra.mxu1 %v188_v12  ;;  %p1235_p8 = pnand %p1234_p7, %p1230_p2 }
  0x26   : > { %373 = vmatpush.msrb.mxu0 %v189_v10  ;;  %450 = vmatpush.msra.mxu2 %v211_v0  ;;  %v205_v10 = vld [vmem:[#allocation2 + $0xd8] sm:$0xff] }
  0x27   : > { %1051 = vmatpush.msra.mxu1 %v187_v14 }
  0x28   : > { %374 = vmatpush.msrb.mxu0 %v188_v12  ;;  %451 = vmatpush.msra.mxu2 %v210_v2  ;;  %v228_v2 = vld [vmem:[#allocation2 + $0x190] sm:$0xff] }
  0x29   : > { %1052 = vmatpush.msra.mxu1 %v186_v16 }
  0x2a   : > { %375 = vmatpush.msrb.mxu0 %v187_v14  ;;  %452 = vmatpush.msra.mxu2 %v209_v3  ;;  %v203_v14 = vld [vmem:[#allocation2 + $0xc8] sm:$0xff] }
  0x2b   : > { %1053 = vmatpush.msra.mxu1 %v185_v18 }
  0x2c   : > { %376 = vmatpush.msrb.mxu0 %v186_v16  ;;  %453 = vmatpush.msra.mxu2 %v208_v4  ;;  %v202_v16 = vld [vmem:[#allocation2 + $0xc0] sm:$0xff] }
  0x2d   : > { %1023 = vmatmul.msk.f32.gmra.mxu0 %vm232_vm1, %v164_v9  ;;  %1054 = vmatpush.msra.mxu1 %v184_v20  ;;  %v206_v9 = vld [vmem:[#allocation2 + $0xe0] sm:$0xff] }
  0x2e   : > { %377 = vmatpush.msrb.mxu0 %v185_v18  ;;  %454 = vmatpush.msra.mxu2 %v207_v7  ;;  %v200_v18 = vld [vmem:[#allocation2 + $0xb0] sm:$0xff]  ;;  %v226_v7 = vld [vmem:[#allocation2 + $0x180] sm:$0xff] }
  0x2f   : > { %1055 = vmatpush.msra.mxu1 %v183_v22 }
  0x30   : > { %378 = vmatpush.msrb.mxu0 %v184_v20  ;;  %455 = vmatpush.msra.mxu2 %v206_v9  ;;  %v224_v9 = vld [vmem:[#allocation2 + $0x170] sm:$0xff] }
  0x31   : > { %1056 = vmatpush.msra.mxu1 %v182_v24 }
  0x32   : > { %379 = vmatpush.msrb.mxu0 %v183_v22  ;;  %456 = vmatpush.msra.mxu2 %v205_v10 }
  0x33   : > { %1057 = vmatpush.msra.mxu1 %v181_v26 }
  0x34   : > { %380 = vmatpush.msrb.mxu0 %v182_v24  ;;  %v197_v24 = vld [vmem:[#allocation2 + $0x98] sm:$0xff] }
  0x35   : > { %1024 = vmatmul.msk.f32.gmra.mxu0 %vm232_vm1, %v165_v11  ;;  %1058 = vmatpush.msra.mxu1 %v180_v28  ;;  %v204_v11 = vld [vmem:[#allocation2 + $0xd0] sm:$0xff] }
  0x36   : > { %381 = vmatpush.msrb.mxu0 %v181_v26  ;;  %457 = vmatpush.msra.mxu2 %v204_v11 }
  0x38   : > { %382 = vmatpush.msrb.mxu0 %v180_v28  ;;  %458 = vmatpush.msra.mxu2 %v203_v14  ;;  %v222_v14 = vld [vmem:[#allocation2 + $0x160] sm:$0xff] }
  0x3a   : > { %459 = vmatpush.msra.mxu2 %v202_v16  ;;  %v220_v16 = vld [vmem:[#allocation2 + $0x150] sm:$0xff] }
  0x3d   : > { %1025 = vmatmul.msk.f32.gmra.mxu0 %vm232_vm1, %v166_v13 }
  0x45   : > { %1026 = vmatmul.msk.f32.gmra.mxu0 %vm232_vm1, %v167_v15 }
  0x4d   : > { %1027 = vmatmul.msk.f32.gmra.mxu0 %vm232_vm1, %v168_v17  ;;  %v201_v17 = vld [vmem:[#allocation2 + $0xb8] sm:$0xff] }
  0x4e   : > { %460 = vmatpush.msra.mxu2 %v201_v17  ;;  %v219_v17 = vld [vmem:[#allocation2 + $0x148] sm:$0xff] }
  0x50   : > { %461 = vmatpush.msra.mxu2 %v200_v18 }
  0x55   : > { %1028 = vmatmul.msk.f32.gmra.mxu0 %vm232_vm1, %v169_v19 }
  0x5d   : > { %1029 = vmatmul.msk.f32.gmra.mxu0 %vm232_vm1, %v170_v21  ;;  %v199_v21 = vld [vmem:[#allocation2 + $0xa8] sm:$0xff] }
  0x5e   : > { %462 = vmatpush.msra.mxu2 %v199_v21 }
  0x65   : > { %1030 = vmatmul.msk.f32.gmra.mxu0 %vm232_vm1, %v171_v23  ;;  %v198_v23 = vld [vmem:[#allocation2 + $0xa0] sm:$0xff] }
  0x66   : > { %463 = vmatpush.msra.mxu2 %v198_v23  ;;  %v216_v23 = vld [vmem:[#allocation2 + $0x130] sm:$0xff] }
  0x68   : > { %464 = vmatpush.msra.mxu2 %v197_v24 }
  0x6d   : > { %1031 = vmatmul.msk.f32.gmra.mxu0 %vm232_vm1, %v172_v25 }
  0x75   : > { %1032 = vmatmul.msk.f32.gmra.mxu0 %vm232_vm1, %v173_v27 }
  0x7d   : > { %1033 = vmatmul.msk.f32.gmra.mxu0 %vm232_vm1, %v174_v29 }
  0x85   : > { %1034 = vmatmul.msk.f32.gmra.mxu0 %vm232_vm1, %v175_v30 }
  0x8d   : > { %1035 = vmatmul.msk.f32.gmra.mxu0 %vm232_vm1, %v176_v31 }
  0x95   : > { %1036 = vmatmul.msk.f32.gmra.mxu0 %vm232_vm1, %v177_v32 }
  0x9a   : > { %v302_v34 = vpop.f32.mrf.mxu0 }
  0x9b   : > { %v303_v35 = vadd.f32 %v1395_v33, %v302_v34 }
  0x9d   : > { %v350_v36 = vmax.f32 %v303_v35, 0.0  ;;  %v1413_v35 = vld [vmem:[#allocation2 + $0x90] ss:$0 sm:$0xff] }
  0x9f   : > { %383 = vmatmul.f32.vlgmr.msrb.gmra.mxu0 %v350_v36 }
  0xa2   : > { %v305_v37 = vpop.f32.mrf.mxu0 }
  0xa3   : > { %v306_v38 = vadd.f32 %v1395_v33, %v305_v37 }
  0xa5   : > { %v351_v39 = vmax.f32 %v306_v38, 0.0 }
  0xa7   : > { %386 = vmatmul.f32.vlgmr.msra.gmra.mxu1 %v351_v39 }
  0xaa   : > { %v308_v40 = vpop.f32.mrf.mxu0 }
  0xab   : > { %v309_v41 = vadd.f32 %v1395_v33, %v308_v40 }
  0xad   : > { %v352_v42 = vmax.f32 %v309_v41, 0.0 }
  0xaf   : > { %389 = vmatmul.f32.gmra.mxu1 %v352_v42 }
  0xb2   : > { %v311_v43 = vpop.f32.mrf.mxu0 }
  0xb3   : > { %v312_v44 = vadd.f32 %v1395_v33, %v311_v43 }
  0xb5   : > { %v353_v45 = vmax.f32 %v312_v44, 0.0 }
  0xb7   : > { %392 = vmatmul.f32.gmra.mxu1 %v353_v45 }
  0xba   : > { %v314_v46 = vpop.f32.mrf.mxu0 }
  0xbb   : > { %v315_v47 = vadd.f32 %v1395_v33, %v314_v46 }
  0xbd   : > { %v354_v48 = vmax.f32 %v315_v47, 0.0 }
  0xbf   : > { %395 = vmatmul.f32.gmra.mxu1 %v354_v48 }
  0xc2   : > { %v317_v49 = vpop.f32.mrf.mxu0 }
  0xc3   : > { %v318_v50 = vadd.f32 %v1395_v33, %v317_v49 }
  0xc5   : > { %v355_v51 = vmax.f32 %v318_v50, 0.0 }
  0xc7   : > { %398 = vmatmul.f32.gmra.mxu1 %v355_v51 }
  0xca   : > { %v320_v52 = vpop.f32.mrf.mxu0 }
  0xcb   : > { %v321_v53 = vadd.f32 %v1395_v33, %v320_v52 }
  0xcd   : > { %v356_v54 = vmax.f32 %v321_v53, 0.0 }
  0xcf   : > { %401 = vmatmul.f32.gmra.mxu1 %v356_v54 }
  0xd2   : > { %v323_v55 = vpop.f32.mrf.mxu0 }
  0xd3   : > { %v324_v56 = vadd.f32 %v1395_v33, %v323_v55 }
  0xd5   : > { %v357_v57 = vmax.f32 %v324_v56, 0.0 }
  0xd7   : > { %404 = vmatmul.f32.gmra.mxu1 %v357_v57 }
  0xda   : > { %v326_v58 = vpop.f32.mrf.mxu0 }
  0xdb   : > { %v327_v59 = vadd.f32 %v1395_v33, %v326_v58 }
  0xdd   : > { %v358_v60 = vmax.f32 %v327_v59, 0.0 }
  0xdf   : > { %407 = vmatmul.f32.gmra.mxu1 %v358_v60 }
  0xe2   : > { %v329_v62 = vpop.f32.mrf.mxu0 }
  0xe3   : > { %v330_v63 = vadd.f32 %v1395_v33, %v329_v62 }
  0xe5   : > { %v359_v1 = vmax.f32 %v330_v63, 0.0 }
  0xe7   : > { %410 = vmatmul.f32.gmra.mxu1 %v359_v1  ;;  %v229_v1 = vld [vmem:[#allocation2 + $0x198] sm:$0xff] }
  0xe8   : > { %531 = vmatpush.msra.mxu3 %v229_v1 }
  0xea   : > { %v332_v5 = vpop.f32.mrf.mxu0  ;;  %532 = vmatpush.msra.mxu3 %v228_v2 }
  0xeb   : > { %v333_v6 = vadd.f32 %v1395_v33, %v332_v5  ;;  %v227_v5 = vld [vmem:[#allocation2 + $0x188] sm:$0xff] }
  0xec   : > { %533 = vmatpush.msra.mxu3 %v227_v5 }
  0xed   : > { %v360_v8 = vmax.f32 %v333_v6, 0.0 }
  0xee   : > { %534 = vmatpush.msra.mxu3 %v226_v7 }
  0xef   : > { %413 = vmatmul.f32.gmra.mxu1 %v360_v8  ;;  %v225_v8 = vld [vmem:[#allocation2 + $0x178] sm:$0xff] }
  0xf0   : > { %535 = vmatpush.msra.mxu3 %v225_v8 }
  0xf2   : > { %v335_v12 = vpop.f32.mrf.mxu0  ;;  %536 = vmatpush.msra.mxu3 %v224_v9 }
  0xf3   : > { %v336_v13 = vadd.f32 %v1395_v33, %v335_v12  ;;  %v223_v12 = vld [vmem:[#allocation2 + $0x168] sm:$0xff] }
  0xf4   : > { %537 = vmatpush.msra.mxu3 %v223_v12 }
  0xf5   : > { %v361_v15 = vmax.f32 %v336_v13, 0.0 }
  0xf6   : > { %538 = vmatpush.msra.mxu3 %v222_v14 }
  0xf7   : > { %416 = vmatmul.f32.gmra.mxu1 %v361_v15  ;;  %v221_v15 = vld [vmem:[#allocation2 + $0x158] sm:$0xff] }
  0xf8   : > { %539 = vmatpush.msra.mxu3 %v221_v15 }
  0xfa   : > { %v338_v19 = vpop.f32.mrf.mxu0  ;;  %540 = vmatpush.msra.mxu3 %v220_v16 }
  0xfb   : > { %v339_v20 = vadd.f32 %v1395_v33, %v338_v19 }
  0xfc   : > { %541 = vmatpush.msra.mxu3 %v219_v17 }
  0xfd   : > { %v362_v22 = vmax.f32 %v339_v20, 0.0  ;;  %v218_v20 = vld [vmem:[#allocation2 + $0x140] sm:$0xff] }
  0xfe   : > { %542 = vmatpush.msra.mxu3 %v218_v20  ;;  %v1431_v20 = vld [vmem:[#allocation2 + $0x1a0] ss:$0 sm:$0xff] }
  0xff   : > { %419 = vmatmul.f32.gmra.mxu1 %v362_v22  ;;  %v217_v22 = vld [vmem:[#allocation2 + $0x138] sm:$0xff] }
 0x100   : > { %543 = vmatpush.msra.mxu3 %v217_v22 }
 0x102   : > { %v341_v25 = vpop.f32.mrf.mxu0  ;;  %544 = vmatpush.msra.mxu3 %v216_v23 }
 0x103   : > { %v342_v26 = vadd.f32 %v1395_v33, %v341_v25 }
 0x105   : > { %v363_v27 = vmax.f32 %v342_v26, 0.0  ;;  %v215_v26 = vld [vmem:[#allocation2 + $0x128] sm:$0xff] }
 0x106   : > { %545 = vmatpush.msra.mxu3 %v215_v26 }
 0x107   : > { %422 = vmatmul.f32.gmra.mxu1 %v363_v27 }
 0x10a   : > { %v344_v28 = vpop.f32.mrf.mxu0 }
 0x10b   : > { %v345_v29 = vadd.f32 %v1395_v33, %v344_v28  ;;  %v214_v28 = vld [vmem:[#allocation2 + $0x120] sm:$0xff] }
 0x10c   : > { %546 = vmatpush.msra.mxu3 %v214_v28 }
 0x10d   : > { %v364_v30 = vmax.f32 %v345_v29, 0.0 }
 0x10f   : > { %425 = vmatmul.f32.gmra.mxu1 %v364_v30 }
 0x112   : > { %v347_v31 = vpop.f32.mrf.mxu0 }
 0x113   : > { %v348_v32 = vadd.f32 %v1395_v33, %v347_v31 }
 0x115   : > { %v365_v34 = vmax.f32 %v348_v32, 0.0 }
 0x117   : > { %428 = vmatmul.f32.gmra.mxu1 %v365_v34 }
 0x11c   : > { %v384_v36 = vpop.f32.mrf.mxu0 }
 0x11d   : > { %v385_v37 = vadd.f32 %v1413_v35, %v384_v36 }
 0x11f   : > { %v432_v38 = vmax.f32 %v385_v37, 0.0  ;;  %v1115_v37 = vld [vmem:[#allocation2 + $0x118] ss:$0 sm:$0xff] }
 0x121   : > { %465 = vmatmul.f32.vlgmr.msra.gmra.mxu2 %v432_v38 }
 0x124   : > { %v387_v39 = vpop.f32.mrf.mxu1 }
 0x125   : > { %v388_v40 = vadd.f32 %v1413_v35, %v387_v39 }
 0x127   : > { %v433_v41 = vmax.f32 %v388_v40, 0.0 }
 0x129   : > { %468 = vmatmul.f32.gmra.mxu2 %v433_v41 }
 0x12c   : > { %v390_v42 = vpop.f32.mrf.mxu1 }
 0x12d   : > { %v391_v43 = vadd.f32 %v1413_v35, %v390_v42 }
 0x12f   : > { %v434_v44 = vmax.f32 %v391_v43, 0.0 }
 0x131   : > { %471 = vmatmul.f32.gmra.mxu2 %v434_v44 }
 0x134   : > { %v393_v33 = vpop.f32.mrf.mxu1 }
 0x135   : > { %v394_v45 = vadd.f32 %v1413_v35, %v393_v33 }
 0x137   : > { %v435_v46 = vmax.f32 %v394_v45, 0.0 }
 0x139   : > { %474 = vmatmul.f32.gmra.mxu2 %v435_v46 }
 0x13c   : > { %v396_v47 = vpop.f32.mrf.mxu1 }
 0x13d   : > { %v397_v48 = vadd.f32 %v1413_v35, %v396_v47 }
 0x13f   : > { %v436_v49 = vmax.f32 %v397_v48, 0.0 }
 0x141   : > { %477 = vmatmul.f32.gmra.mxu2 %v436_v49 }
 0x144   : > { %v399_v50 = vpop.f32.mrf.mxu1 }
 0x145   : > { %v400_v51 = vadd.f32 %v1413_v35, %v399_v50 }
 0x147   : > { %v437_v52 = vmax.f32 %v400_v51, 0.0 }
 0x149   : > { %480 = vmatmul.f32.gmra.mxu2 %v437_v52 }
 0x14c   : > { %v402_v53 = vpop.f32.mrf.mxu1 }
 0x14d   : > { %v403_v54 = vadd.f32 %v1413_v35, %v402_v53 }
 0x14f   : > { %v438_v55 = vmax.f32 %v403_v54, 0.0 }
 0x151   : > { %483 = vmatmul.f32.gmra.mxu2 %v438_v55 }
 0x154   : > { %v405_v56 = vpop.f32.mrf.mxu1 }
 0x155   : > { %v406_v57 = vadd.f32 %v1413_v35, %v405_v56 }
 0x157   : > { %v439_v58 = vmax.f32 %v406_v57, 0.0 }
 0x159   : > { %486 = vmatmul.f32.gmra.mxu2 %v439_v58 }
 0x15c   : > { %v408_v59 = vpop.f32.mrf.mxu1 }
 0x15d   : > { %v409_v60 = vadd.f32 %v1413_v35, %v408_v59 }
 0x15f   : > { %v440_v61 = vmax.f32 %v409_v60, 0.0 }
 0x161   : > { %489 = vmatmul.f32.gmra.mxu2 %v440_v61 }
 0x164   : > { %v411_v62 = vpop.f32.mrf.mxu1 }
 0x165   : > { %v412_v63 = vadd.f32 %v1413_v35, %v411_v62 }
 0x167   : > { %v441_v0 = vmax.f32 %v412_v63, 0.0 }
 0x169   : > { %492 = vmatmul.f32.gmra.mxu2 %v441_v0 }
 0x16c   : > { %v414_v3 = vpop.f32.mrf.mxu1 }
 0x16d   : > { %v415_v4 = vadd.f32 %v1413_v35, %v414_v3 }
 0x16f   : > { %v442_v6 = vmax.f32 %v415_v4, 0.0 }
 0x171   : > { %495 = vmatmul.f32.gmra.mxu2 %v442_v6 }
 0x174   : > { %v417_v10 = vpop.f32.mrf.mxu1 }
 0x175   : > { %v418_v11 = vadd.f32 %v1413_v35, %v417_v10 }
 0x177   : > { %v443_v13 = vmax.f32 %v418_v11, 0.0 }
 0x179   : > { %498 = vmatmul.f32.gmra.mxu2 %v443_v13 }
 0x17c   : > { %v420_v18 = vpop.f32.mrf.mxu1 }
 0x17d   : > { %v421_v19 = vadd.f32 %v1413_v35, %v420_v18 }
 0x17f   : > { %v444_v21 = vmax.f32 %v421_v19, 0.0 }
 0x181   : > { %501 = vmatmul.f32.gmra.mxu2 %v444_v21 }
 0x184   : > { %v423_v24 = vpop.f32.mrf.mxu1 }
 0x185   : > { %v424_v25 = vadd.f32 %v1413_v35, %v423_v24 }
 0x187   : > { %v445_v27 = vmax.f32 %v424_v25, 0.0 }
 0x189   : > { %504 = vmatmul.f32.gmra.mxu2 %v445_v27 }
 0x18c   : > { %v426_v29 = vpop.f32.mrf.mxu1 }
 0x18d   : > { %v427_v30 = vadd.f32 %v1413_v35, %v426_v29 }
 0x18f   : > { %v446_v31 = vmax.f32 %v427_v30, 0.0 }
 0x191   : > { %507 = vmatmul.f32.gmra.mxu2 %v446_v31 }
 0x194   : > { %v429_v32 = vpop.f32.mrf.mxu1 }
 0x195   : > { %v430_v34 = vadd.f32 %v1413_v35, %v429_v32  ;;  %v596_v32 = vlaneseq }
 0x197   : > { %v447_v36 = vmax.f32 %v430_v34, 0.0 }
 0x199   : > { %510 = vmatmul.f32.gmra.mxu2 %v447_v36 }
 0x1a4   : > { %v466_v38 = vpop.f32.mrf.mxu2 }
 0x1a5   : > { %v467_v39 = vadd.f32 %v1115_v37, %v466_v38 }
 0x1a7   : > { %v514_v40 = vmax.f32 %v467_v39, 0.0 }
 0x1a9   : > { %547 = vmatmul.f32.vlgmr.msra.gmra.mxu3 %v514_v40  ;;  %v597_v40 = vand.u32 127, %v596_v32 }
 0x1ab   : > { %vm598_vm2 = vcmp.ge.s32.totalorder %v597_v40, 4  ;;  %vm599_vm3 = vcmp.lt.s32.totalorder %v597_v40, 8 }
 0x1ac   : > { %v469_v41 = vpop.f32.mrf.mxu2  ;;  %vm1450_vm5 = vmand %vm598_vm2, %vm599_vm3 }
 0x1ad   : > { %v470_v42 = vadd.f32 %v1115_v37, %v469_v41 }
 0x1af   : > { %v515_v43 = vmax.f32 %v470_v42, 0.0 }
 0x1b1   : > { %550 = vmatmul.f32.gmra.mxu3 %v515_v43 }
 0x1b4   : > { %v472_v44 = vpop.f32.mrf.mxu2 }
 0x1b5   : > { %v473_v33 = vadd.f32 %v1115_v37, %v472_v44 }
 0x1b7   : > { %v516_v45 = vmax.f32 %v473_v33, 0.0 }
 0x1b9   : > { %553 = vmatmul.f32.gmra.mxu3 %v516_v45 }
 0x1bc   : > { %v475_v46 = vpop.f32.mrf.mxu2 }
 0x1bd   : > { %v476_v47 = vadd.f32 %v1115_v37, %v475_v46 }
 0x1bf   : > { %v517_v48 = vmax.f32 %v476_v47, 0.0 }
 0x1c1   : > { %556 = vmatmul.f32.gmra.mxu3 %v517_v48 }
 0x1c4   : > { %v478_v35 = vpop.f32.mrf.mxu2 }
 0x1c5   : > { %v479_v49 = vadd.f32 %v1115_v37, %v478_v35 }
 0x1c7   : > { %v518_v50 = vmax.f32 %v479_v49, 0.0 }
 0x1c9   : > { %559 = vmatmul.f32.gmra.mxu3 %v518_v50 }
 0x1cc   : > { %v481_v51 = vpop.f32.mrf.mxu2 }
 0x1cd   : > { %v482_v52 = vadd.f32 %v1115_v37, %v481_v51 }
 0x1cf   : > { %v519_v53 = vmax.f32 %v482_v52, 0.0 }
 0x1d1   : > { %562 = vmatmul.f32.gmra.mxu3 %v519_v53 }
 0x1d4   : > { %v484_v54 = vpop.f32.mrf.mxu2 }
 0x1d5   : > { %v485_v55 = vadd.f32 %v1115_v37, %v484_v54 }
 0x1d7   : > { %v520_v56 = vmax.f32 %v485_v55, 0.0 }
 0x1d9   : > { %565 = vmatmul.f32.gmra.mxu3 %v520_v56 }
 0x1dc   : > { %v487_v57 = vpop.f32.mrf.mxu2 }
 0x1dd   : > { %v488_v58 = vadd.f32 %v1115_v37, %v487_v57 }
 0x1df   : > { %v521_v59 = vmax.f32 %v488_v58, 0.0 }
 0x1e1   : > { %568 = vmatmul.f32.gmra.mxu3 %v521_v59 }
 0x1e4   : > { %v490_v60 = vpop.f32.mrf.mxu2 }
 0x1e5   : > { %v491_v61 = vadd.f32 %v1115_v37, %v490_v60 }
 0x1e7   : > { %v522_v62 = vmax.f32 %v491_v61, 0.0 }
 0x1e9   : > { %571 = vmatmul.f32.gmra.mxu3 %v522_v62 }
 0x1ec   : > { %v493_v63 = vpop.f32.mrf.mxu2 }
 0x1ed   : > { %v494_v0 = vadd.f32 %v1115_v37, %v493_v63 }
 0x1ef   : > { %v523_v1 = vmax.f32 %v494_v0, 0.0 }
 0x1f1   : > { %574 = vmatmul.f32.gmra.mxu3 %v523_v1 }
 0x1f4   : > { %v496_v2 = vpop.f32.mrf.mxu2 }
 0x1f5   : > { %v497_v3 = vadd.f32 %v1115_v37, %v496_v2 }
 0x1f7   : > { %v524_v4 = vmax.f32 %v497_v3, 0.0 }
 0x1f9   : > { %577 = vmatmul.f32.gmra.mxu3 %v524_v4 }
 0x1fc   : > { %v499_v5 = vpop.f32.mrf.mxu2 }
 0x1fd   : > { %v500_v6 = vadd.f32 %v1115_v37, %v499_v5 }
 0x1ff   : > { %v525_v7 = vmax.f32 %v500_v6, 0.0 }
 0x201   : > { %580 = vmatmul.f32.gmra.mxu3 %v525_v7 }
 0x204   : > { %v502_v8 = vpop.f32.mrf.mxu2 }
 0x205   : > { %v503_v9 = vadd.f32 %v1115_v37, %v502_v8 }
 0x207   : > { %v526_v10 = vmax.f32 %v503_v9, 0.0 }
 0x209   : > { %583 = vmatmul.f32.gmra.mxu3 %v526_v10 }
 0x20c   : > { %v505_v11 = vpop.f32.mrf.mxu2 }
 0x20d   : > { %v506_v12 = vadd.f32 %v1115_v37, %v505_v11 }
 0x20f   : > { %v527_v13 = vmax.f32 %v506_v12, 0.0 }
 0x211   : > { %586 = vmatmul.f32.gmra.mxu3 %v527_v13 }
 0x214   : > { %v508_v14 = vpop.f32.mrf.mxu2 }
 0x215   : > { %v509_v15 = vadd.f32 %v1115_v37, %v508_v14 }
 0x217   : > { %v528_v16 = vmax.f32 %v509_v15, 0.0 }
 0x219   : > { %589 = vmatmul.f32.gmra.mxu3 %v528_v16 }
 0x21c   : > { %v511_v17 = vpop.f32.mrf.mxu2 }
 0x21d   : > { %v512_v18 = vadd.f32 %v1115_v37, %v511_v17 }
 0x21f   : > { %v529_v19 = vmax.f32 %v512_v18, 0.0 }
 0x221   : > { %592 = vmatmul.f32.gmra.mxu3 %v529_v19 }
 0x22c   : > { %v548_v21 = vpop.f32.mrf.mxu3 }
 0x22d   : > { %v549_v22 = vadd.f32 %v1431_v20, %v548_v21 }
 0x22f   : > { %v649_v23 = vand.u32 2147483647, %v549_v22  ;;  %v601_v51 = vmax.f32 %v549_v22, 0.0  ;;  %vm617_vm6 = vcmp.ne.f32.partialorder %v549_v22, %v549_v22 }
 0x231   : > { %v665_v24 = vsub.f32 0.0, %v649_v23 }
 0x233   : > { %v681_v25 = vmul.f32 1.442695, %v665_v24 }
 0x234   : > { %v551_v26 = vpop.f32.mrf.mxu3 }
 0x235   : > { %1117 = vpow2.f32 %v681_v25  ;;  %v1435_v27 = vadd.f32 %v1431_v20, %v551_v26 }
 0x237   : > { %v650_v28 = vand.u32 2147483647, %v1435_v27  ;;  %v602_v6 = vmax.f32 %v1435_v27, 0.0  ;;  %vm618_vm8 = vcmp.ne.f32.partialorder %v1435_v27, %v1435_v27 }
 0x239   : > { %v666_v29 = vsub.f32 0.0, %v650_v28 }
 0x23b   : > { %v1118_v30 = vpop.eup %1117  ;;  %v683_v31 = vmul.f32 1.442695, %v666_v29 }
 0x23c   : > { %v713_v34 = vadd.f32 1.0, %v1118_v30  ;;  %v716_v36 = vmul.f32 -0.5, %v1118_v30  ;;  %v554_v37 = vpop.f32.mrf.mxu3  ;;  %v719_v43 = vand.u32 2147483647, %v1118_v30 }
 0x23d   : > { %1119 = vpow2.f32 %v683_v31  ;;  %v1439_v38 = vadd.f32 %v1431_v20, %v554_v37 }
 0x23e   : > { %1121 = vlog2.f32 %v713_v34  ;;  %v717_v41 = vadd.f32 1.0, %v716_v36  ;;  %vm720_vm4 = vcmp.lt.f32.partialorder %v719_v43, 0.0004427343 }
 0x23f   : > { %v651_v39 = vand.u32 2147483647, %v1439_v38  ;;  %v603_v25 = vmax.f32 %v1439_v38, 0.0  ;;  %vm619_vm10 = vcmp.ne.f32.partialorder %v1439_v38, %v1439_v38 }
 0x240   : > { %v718_v46 = vmul.f32 %v1118_v30, %v717_v41 }
 0x241   : > { %v667_v42 = vsub.f32 0.0, %v651_v39 }
 0x243   : > { %v1120_v44 = vpop.eup %1119  ;;  %v685_v33 = vmul.f32 1.442695, %v667_v42 }
 0x244   : > { %v1122_v45 = vpop.eup %1121  ;;  %v722_v47 = vadd.f32 1.0, %v1120_v44  ;;  %v557_v48 = vpop.f32.mrf.mxu3  ;;  %v725_v49 = vmul.f32 -0.5, %v1120_v44  ;;  %v728_v59 = vand.u32 2147483647, %v1120_v44 }
 0x245   : > { %v715_v35 = vmul.f32 0.6931472, %v1122_v45  ;;  %1123 = vpow2.f32 %v685_v33  ;;  %v1444_v50 = vadd.f32 %v1431_v20, %v557_v48 }
 0x246   : > { %1125 = vlog2.f32 %v722_v47  ;;  %v726_v56 = vadd.f32 1.0, %v725_v49  ;;  %vm729_vm7 = vcmp.lt.f32.partialorder %v728_v59, 0.0004427343 }
 0x247   : > { %v721_v52 = vsel %vm720_vm4, %v718_v46, %v715_v35  ;;  %v652_v53 = vand.u32 2147483647, %v1444_v50  ;;  %v604_v45 = vmax.f32 %v1444_v50, 0.0  ;;  %vm620_vm12 = vcmp.ne.f32.partialorder %v1444_v50, %v1444_v50 }
 0x248   : > { %v857_v55 = vadd.f32 %v721_v52, %v601_v51  ;;  %v727_v4 = vmul.f32 %v1120_v44, %v726_v56 }
 0x249   : > { %v668_v57 = vsub.f32 0.0, %v652_v53 }
 0x24a   : > { %v873_v58 = vsel %vm617_vm6, %v549_v22, %v857_v55 }
 0x24b   : > { %v1124_v60 = vpop.eup %1123  ;;  %v889_v61 = vsel %vm1450_vm5, %v873_v58, %v549_v22  ;;  %v687_v62 = vmul.f32 1.442695, %v668_v57 }
 0x24c   : > { %v1126_v63 = vpop.eup %1125  ;;  %905 = vst [vmem:[%s1456_s7] sm:$0xff] %v889_v61  ;;  %v731_v0 = vadd.f32 1.0, %v1124_v60  ;;  %v734_v1 = vmul.f32 -0.5, %v1124_v60  ;;  %v560_v2 = vpop.f32.mrf.mxu3  ;;  %v737_v13 = vand.u32 2147483647, %v1124_v60 }
 0x24d   : > { %v724_v3 = vmul.f32 0.6931472, %v1126_v63  ;;  %1127 = vpow2.f32 %v687_v62  ;;  %v1460_v5 = vadd.f32 %v1431_v20, %v560_v2 }
 0x24e   : > { %1129 = vlog2.f32 %v731_v0  ;;  %v735_v10 = vadd.f32 1.0, %v734_v1  ;;  %vm738_vm9 = vcmp.lt.f32.partialorder %v737_v13, 0.0004427343 }
 0x24f   : > { %v730_v7 = vsel %vm729_vm7, %v727_v4, %v724_v3  ;;  %v653_v8 = vand.u32 2147483647, %v1460_v5  ;;  %v605_v63 = vmax.f32 %v1460_v5, 0.0  ;;  %vm621_vm14 = vcmp.ne.f32.partialorder %v1460_v5, %v1460_v5 }
 0x250   : > { %v858_v9 = vadd.f32 %v730_v7, %v602_v6  ;;  %v736_v18 = vmul.f32 %v1124_v60, %v735_v10 }
 0x251   : > { %v669_v11 = vsub.f32 0.0, %v653_v8 }
 0x252   : > { %v874_v12 = vsel %vm618_vm8, %v1435_v27, %v858_v9 }
 0x253   : > { %v1128_v14 = vpop.eup %1127  ;;  %v890_v15 = vsel %vm1450_vm5, %v874_v12, %v1435_v27  ;;  %v689_v16 = vmul.f32 1.442695, %v669_v11 }
 0x254   : > { %v1130_v17 = vpop.eup %1129  ;;  %906 = vst [vmem:[%s1456_s7 + $0x8] sm:$0xff] %v890_v15  ;;  %v740_v19 = vadd.f32 1.0, %v1128_v14  ;;  %v563_v21 = vpop.f32.mrf.mxu3  ;;  %v743_v23 = vmul.f32 -0.5, %v1128_v14  ;;  %v746_v32 = vand.u32 2147483647, %v1128_v14 }
 0x255   : > { %v733_v22 = vmul.f32 0.6931472, %v1130_v17  ;;  %1131 = vpow2.f32 %v689_v16  ;;  %v1472_v24 = vadd.f32 %v1431_v20, %v563_v21 }
 0x256   : > { %1133 = vlog2.f32 %v740_v19  ;;  %v744_v29 = vadd.f32 1.0, %v743_v23  ;;  %vm747_vm11 = vcmp.lt.f32.partialorder %v746_v32, 0.0004427343 }
 0x257   : > { %v739_v26 = vsel %vm738_vm9, %v736_v18, %v733_v22  ;;  %v654_v27 = vand.u32 2147483647, %v1472_v24  ;;  %v606_v17 = vmax.f32 %v1472_v24, 0.0  ;;  %vm622_vm0 = vcmp.ne.f32.partialorder %v1472_v24, %v1472_v24 }
 0x258   : > { %v859_v28 = vadd.f32 %v739_v26, %v603_v25  ;;  %v745_v44 = vmul.f32 %v1128_v14, %v744_v29 }
 0x259   : > { %v670_v30 = vsub.f32 0.0, %v654_v27 }
 0x25a   : > { %v875_v31 = vsel %vm619_vm10, %v1439_v38, %v859_v28 }
 0x25b   : > { %v1132_v34 = vpop.eup %1131  ;;  %v891_v36 = vsel %vm1450_vm5, %v875_v31, %v1439_v38  ;;  %v691_v37 = vmul.f32 1.442695, %v670_v30 }
 0x25c   : > { %v1134_v39 = vpop.eup %1133  ;;  %907 = vst [vmem:[%s1456_s7 + $0x10] sm:$0xff] %v891_v36  ;;  %v749_v40 = vadd.f32 1.0, %v1132_v34  ;;  %v752_v41 = vmul.f32 -0.5, %v1132_v34  ;;  %v566_v42 = vpop.f32.mrf.mxu3  ;;  %v755_v51 = vand.u32 2147483647, %v1132_v34 }
 0x25d   : > { %v742_v43 = vmul.f32 0.6931472, %v1134_v39  ;;  %1135 = vpow2.f32 %v691_v37  ;;  %v1484_v33 = vadd.f32 %v1431_v20, %v566_v42 }
 0x25e   : > { %1137 = vlog2.f32 %v749_v40  ;;  %v753_v48 = vadd.f32 1.0, %v752_v41  ;;  %vm756_vm13 = vcmp.lt.f32.partialorder %v755_v51, 0.0004427343 }
 0x25f   : > { %v748_v46 = vsel %vm747_vm11, %v745_v44, %v742_v43  ;;  %v655_v38 = vand.u32 2147483647, %v1484_v33  ;;  %v607_v39 = vmax.f32 %v1484_v33, 0.0  ;;  %vm623_vm2 = vcmp.ne.f32.partialorder %v1484_v33, %v1484_v33 }
 0x260   : > { %v860_v47 = vadd.f32 %v748_v46, %v604_v45  ;;  %v754_v57 = vmul.f32 %v1132_v34, %v753_v48 }
 0x261   : > { %v671_v35 = vsub.f32 0.0, %v655_v38 }
 0x262   : > { %v876_v49 = vsel %vm620_vm12, %v1444_v50, %v860_v47 }
 0x263   : > { %v1136_v52 = vpop.eup %1135  ;;  %v892_v53 = vsel %vm1450_vm5, %v876_v49, %v1444_v50  ;;  %v693_v55 = vmul.f32 1.442695, %v671_v35 }
 0x264   : > { %v1138_v56 = vpop.eup %1137  ;;  %908 = vst [vmem:[%s1456_s7 + $0x18] sm:$0xff] %v892_v53  ;;  %v758_v58 = vadd.f32 1.0, %v1136_v52  ;;  %v569_v59 = vpop.f32.mrf.mxu3  ;;  %v761_v61 = vmul.f32 -0.5, %v1136_v52  ;;  %v764_v6 = vand.u32 2147483647, %v1136_v52 }
 0x265   : > { %v751_v60 = vmul.f32 0.6931472, %v1138_v56  ;;  %1139 = vpow2.f32 %v693_v55  ;;  %v1496_v62 = vadd.f32 %v1431_v20, %v569_v59 }
 0x266   : > { %1141 = vlog2.f32 %v758_v58  ;;  %v762_v2 = vadd.f32 1.0, %v761_v61  ;;  %vm765_vm15 = vcmp.lt.f32.partialorder %v764_v6, 0.0004427343 }
 0x267   : > { %v757_v0 = vsel %vm756_vm13, %v754_v57, %v751_v60  ;;  %v656_v50 = vand.u32 2147483647, %v1496_v62  ;;  %v608_v56 = vmax.f32 %v1496_v62, 0.0  ;;  %vm624_vm4 = vcmp.ne.f32.partialorder %v1496_v62, %v1496_v62 }
 0x268   : > { %v861_v1 = vadd.f32 %v757_v0, %v605_v63  ;;  %v763_v15 = vmul.f32 %v1136_v52, %v762_v2 }
 0x269   : > { %v672_v3 = vsub.f32 0.0, %v656_v50 }
 0x26a   : > { %v877_v4 = vsel %vm621_vm14, %v1460_v5, %v861_v1 }
 0x26b   : > { %v1140_v7 = vpop.eup %1139  ;;  %v893_v8 = vsel %vm1450_vm5, %v877_v4, %v1460_v5  ;;  %v695_v9 = vmul.f32 1.442695, %v672_v3 }
 0x26c   : > { %v1142_v10 = vpop.eup %1141  ;;  %909 = vst [vmem:[%s1456_s7 + $0x20] sm:$0xff] %v893_v8  ;;  %v767_v11 = vadd.f32 1.0, %v1140_v7  ;;  %v770_v12 = vmul.f32 -0.5, %v1140_v7  ;;  %v572_v13 = vpop.f32.mrf.mxu3  ;;  %v773_v25 = vand.u32 2147483647, %v1140_v7 }
 0x26d   : > { %v760_v14 = vmul.f32 0.6931472, %v1142_v10  ;;  %1143 = vpow2.f32 %v695_v9  ;;  %v1508_v16 = vadd.f32 %v1431_v20, %v572_v13 }
 0x26e   : > { %1145 = vlog2.f32 %v767_v11  ;;  %v771_v21 = vadd.f32 1.0, %v770_v12  ;;  %vm774_vm1 = vcmp.lt.f32.partialorder %v773_v25, 0.0004427343 }
 0x26f   : > { %v766_v18 = vsel %vm765_vm15, %v763_v15, %v760_v14  ;;  %v657_v5 = vand.u32 2147483647, %v1508_v16  ;;  %v609_v10 = vmax.f32 %v1508_v16, 0.0  ;;  %vm625_vm7 = vcmp.ne.f32.partialorder %v1508_v16, %v1508_v16 }
 0x270   : > { %v862_v19 = vadd.f32 %v766_v18, %v606_v17  ;;  %v772_v30 = vmul.f32 %v1140_v7, %v771_v21 }
 0x271   : > { %v673_v22 = vsub.f32 0.0, %v657_v5 }
 0x272   : > { %v878_v23 = vsel %vm622_vm0, %v1472_v24, %v862_v19 }
 0x273   : > { %v1144_v26 = vpop.eup %1143  ;;  %v894_v27 = vsel %vm1450_vm5, %v878_v23, %v1472_v24  ;;  %v697_v28 = vmul.f32 1.442695, %v673_v22 }
 0x274   : > { %v1146_v29 = vpop.eup %1145  ;;  %910 = vst [vmem:[%s1456_s7 + $0x28] sm:$0xff] %v894_v27  ;;  %v776_v31 = vadd.f32 1.0, %v1144_v26  ;;  %v575_v32 = vpop.f32.mrf.mxu3  ;;  %v779_v36 = vmul.f32 -0.5, %v1144_v26  ;;  %v782_v45 = vand.u32 2147483647, %v1144_v26 }
 0x275   : > { %v769_v34 = vmul.f32 0.6931472, %v1146_v29  ;;  %1147 = vpow2.f32 %v697_v28  ;;  %v1520_v37 = vadd.f32 %v1431_v20, %v575_v32 }
 0x276   : > { %1149 = vlog2.f32 %v776_v31  ;;  %v780_v42 = vadd.f32 1.0, %v779_v36  ;;  %vm783_vm3 = vcmp.lt.f32.partialorder %v782_v45, 0.0004427343 }
 0x277   : > { %v775_v40 = vsel %vm774_vm1, %v772_v30, %v769_v34  ;;  %v658_v24 = vand.u32 2147483647, %v1520_v37  ;;  %v610_v29 = vmax.f32 %v1520_v37, 0.0  ;;  %vm626_vm9 = vcmp.ne.f32.partialorder %v1520_v37, %v1520_v37 }
 0x278   : > { %v863_v41 = vadd.f32 %v775_v40, %v607_v39  ;;  %v781_v53 = vmul.f32 %v1144_v26, %v780_v42 }
 0x279   : > { %v674_v43 = vsub.f32 0.0, %v658_v24 }
 0x27a   : > { %v879_v44 = vsel %vm623_vm2, %v1484_v33, %v863_v41 }
 0x27b   : > { %v1148_v46 = vpop.eup %1147  ;;  %v895_v38 = vsel %vm1450_vm5, %v879_v44, %v1484_v33  ;;  %v699_v47 = vmul.f32 1.442695, %v674_v43 }
 0x27c   : > { %v1150_v48 = vpop.eup %1149  ;;  %911 = vst [vmem:[%s1456_s7 + $0x30] sm:$0xff] %v895_v38  ;;  %v785_v35 = vadd.f32 1.0, %v1148_v46  ;;  %v788_v49 = vmul.f32 -0.5, %v1148_v46  ;;  %v578_v51 = vpop.f32.mrf.mxu3  ;;  %v791_v63 = vand.u32 2147483647, %v1148_v46 }
 0x27d   : > { %v778_v52 = vmul.f32 0.6931472, %v1150_v48  ;;  %1151 = vpow2.f32 %v699_v47  ;;  %v1532_v55 = vadd.f32 %v1431_v20, %v578_v51 }
 0x27e   : > { %1153 = vlog2.f32 %v785_v35  ;;  %v789_v59 = vadd.f32 1.0, %v788_v49  ;;  %vm792_vm6 = vcmp.lt.f32.partialorder %v791_v63, 0.0004427343 }
 0x27f   : > { %v784_v57 = vsel %vm783_vm3, %v781_v53, %v778_v52  ;;  %v659_v33 = vand.u32 2147483647, %v1532_v55  ;;  %v611_v48 = vmax.f32 %v1532_v55, 0.0  ;;  %vm627_vm11 = vcmp.ne.f32.partialorder %v1532_v55, %v1532_v55 }
 0x280   : > { %v864_v58 = vadd.f32 %v784_v57, %v608_v56  ;;  %v790_v3 = vmul.f32 %v1148_v46, %v789_v59 }
 0x281   : > { %v675_v60 = vsub.f32 0.0, %v659_v33 }
 0x282   : > { %v880_v61 = vsel %vm624_vm4, %v1496_v62, %v864_v58 }
 0x283   : > { %v1152_v0 = vpop.eup %1151  ;;  %v896_v50 = vsel %vm1450_vm5, %v880_v61, %v1496_v62  ;;  %v701_v1 = vmul.f32 1.442695, %v675_v60 }
 0x284   : > { %v1154_v2 = vpop.eup %1153  ;;  %912 = vst [vmem:[%s1456_s7 + $0x38] sm:$0xff] %v896_v50  ;;  %v794_v4 = vadd.f32 1.0, %v1152_v0  ;;  %v581_v6 = vpop.f32.mrf.mxu3  ;;  %v797_v8 = vmul.f32 -0.5, %v1152_v0  ;;  %v800_v17 = vand.u32 2147483647, %v1152_v0 }
 0x285   : > { %v787_v7 = vmul.f32 0.6931472, %v1154_v2  ;;  %1155 = vpow2.f32 %v701_v1  ;;  %v1544_v9 = vadd.f32 %v1431_v20, %v581_v6 }
 0x286   : > { %1157 = vlog2.f32 %v794_v4  ;;  %v798_v13 = vadd.f32 1.0, %v797_v8  ;;  %vm801_vm8 = vcmp.lt.f32.partialorder %v800_v17, 0.0004427343 }
 0x287   : > { %v793_v11 = vsel %vm792_vm6, %v790_v3, %v787_v7  ;;  %v660_v62 = vand.u32 2147483647, %v1544_v9  ;;  %v612_v2 = vmax.f32 %v1544_v9, 0.0  ;;  %vm628_vm13 = vcmp.ne.f32.partialorder %v1544_v9, %v1544_v9 }
 0x288   : > { %v865_v12 = vadd.f32 %v793_v11, %v609_v10  ;;  %v799_v27 = vmul.f32 %v1152_v0, %v798_v13 }
 0x289   : > { %v676_v14 = vsub.f32 0.0, %v660_v62 }
 0x28a   : > { %v881_v15 = vsel %vm625_vm7, %v1508_v16, %v865_v12 }
 0x28b   : > { %v1156_v18 = vpop.eup %1155  ;;  %v897_v5 = vsel %vm1450_vm5, %v881_v15, %v1508_v16  ;;  %v703_v19 = vmul.f32 1.442695, %v676_v14 }
 0x28c   : > { %v1158_v21 = vpop.eup %1157  ;;  %913 = vst [vmem:[%s1456_s7 + $0x40] sm:$0xff] %v897_v5  ;;  %v803_v22 = vadd.f32 1.0, %v1156_v18  ;;  %v806_v23 = vmul.f32 -0.5, %v1156_v18  ;;  %v584_v25 = vpop.f32.mrf.mxu3  ;;  %v809_v39 = vand.u32 2147483647, %v1156_v18 }
 0x28d   : > { %v796_v26 = vmul.f32 0.6931472, %v1158_v21  ;;  %1159 = vpow2.f32 %v703_v19  ;;  %v1556_v28 = vadd.f32 %v1431_v20, %v584_v25 }
 0x28e   : > { %1161 = vlog2.f32 %v803_v22  ;;  %v807_v32 = vadd.f32 1.0, %v806_v23  ;;  %vm810_vm10 = vcmp.lt.f32.partialorder %v809_v39, 0.0004427343 }
 0x28f   : > { %v802_v30 = vsel %vm801_vm8, %v799_v27, %v796_v26  ;;  %v661_v16 = vand.u32 2147483647, %v1556_v28  ;;  %v613_v21 = vmax.f32 %v1556_v28, 0.0  ;;  %vm629_vm15 = vcmp.ne.f32.partialorder %v1556_v28, %v1556_v28 }
 0x290   : > { %v866_v31 = vadd.f32 %v802_v30, %v610_v29  ;;  %v808_v43 = vmul.f32 %v1156_v18, %v807_v32 }
 0x291   : > { %v677_v34 = vsub.f32 0.0, %v661_v16 }
 0x292   : > { %v882_v36 = vsel %vm626_vm9, %v1520_v37, %v866_v31 }
 0x293   : > { %v1160_v40 = vpop.eup %1159  ;;  %v898_v24 = vsel %vm1450_vm5, %v882_v36, %v1520_v37  ;;  %v705_v41 = vmul.f32 1.442695, %v677_v34 }
 0x294   : > { %v1162_v42 = vpop.eup %1161  ;;  %914 = vst [vmem:[%s1456_s7 + $0x48] sm:$0xff] %v898_v24  ;;  %v812_v44 = vadd.f32 1.0, %v1160_v40  ;;  %v587_v45 = vpop.f32.mrf.mxu3  ;;  %v815_v38 = vmul.f32 -0.5, %v1160_v40  ;;  %v818_v56 = vand.u32 2147483647, %v1160_v40 }
 0x295   : > { %v805_v46 = vmul.f32 0.6931472, %v1162_v42  ;;  %1163 = vpow2.f32 %v705_v41  ;;  %v1568_v47 = vadd.f32 %v1431_v20, %v587_v45 }
 0x296   : > { %1165 = vlog2.f32 %v812_v44  ;;  %v816_v51 = vadd.f32 1.0, %v815_v38  ;;  %vm819_vm12 = vcmp.lt.f32.partialorder %v818_v56, 0.0004427343 }
 0x297   : > { %v811_v35 = vsel %vm810_vm10, %v808_v43, %v805_v46  ;;  %v662_v37 = vand.u32 2147483647, %v1568_v47  ;;  %vm630_vm1 = vcmp.ne.f32.partialorder %v1568_v47, %v1568_v47 }
 0x298   : > { %v867_v49 = vadd.f32 %v811_v35, %v611_v48  ;;  %v817_v50 = vmul.f32 %v1160_v40, %v816_v51  ;;  %v614_v40 = vmax.f32 %v1568_v47, 0.0 }
 0x299   : > { %v678_v52 = vsub.f32 0.0, %v662_v37 }
 0x29a   : > { %v883_v53 = vsel %vm627_vm11, %v1532_v55, %v867_v49 }
 0x29b   : > { %v1164_v57 = vpop.eup %1163  ;;  %v899_v33 = vsel %vm1450_vm5, %v883_v53, %v1532_v55  ;;  %v707_v58 = vmul.f32 1.442695, %v678_v52 }
 0x29c   : > { %v1166_v59 = vpop.eup %1165  ;;  %915 = vst [vmem:[%s1456_s7 + $0x50] sm:$0xff] %v899_v33  ;;  %v821_v60 = vadd.f32 1.0, %v1164_v57  ;;  %v824_v61 = vmul.f32 -0.5, %v1164_v57  ;;  %v590_v63 = vpop.f32.mrf.mxu3  ;;  %v827_v10 = vand.u32 2147483647, %v1164_v57 }
 0x29d   : > { %v814_v0 = vmul.f32 0.6931472, %v1166_v59  ;;  %1167 = vpow2.f32 %v707_v58  ;;  %v1580_v1 = vadd.f32 %v1431_v20, %v590_v63 }
 0x29e   : > { %1169 = vlog2.f32 %v821_v60  ;;  %v825_v6 = vadd.f32 1.0, %v824_v61  ;;  %vm828_vm14 = vcmp.lt.f32.partialorder %v827_v10, 0.0004427343 }
 0x29f   : > { %v820_v3 = vsel %vm819_vm12, %v817_v50, %v814_v0  ;;  %v663_v55 = vand.u32 2147483647, %v1580_v1  ;;  %v615_v49 = vmax.f32 %v1580_v1, 0.0  ;;  %vm631_vm3 = vcmp.ne.f32.partialorder %v1580_v1, %v1580_v1 }
 0x2a0   : > { %v868_v4 = vadd.f32 %v820_v3, %v612_v2  ;;  %v826_v14 = vmul.f32 %v1164_v57, %v825_v6 }
 0x2a1   : > { %v679_v7 = vsub.f32 0.0, %v663_v55 }
 0x2a2   : > { %v884_v8 = vsel %vm628_vm13, %v1544_v9, %v868_v4 }
 0x2a3   : > { %v1168_v11 = vpop.eup %1167  ;;  %v900_v62 = vsel %vm1450_vm5, %v884_v8, %v1544_v9  ;;  %v709_v12 = vmul.f32 1.442695, %v679_v7 }
 0x2a4   : > { %v1170_v13 = vpop.eup %1169  ;;  %916 = vst [vmem:[%s1456_s7 + $0x58] sm:$0xff] %v900_v62  ;;  %v830_v15 = vadd.f32 1.0, %v1168_v11  ;;  %v593_v17 = vpop.f32.mrf.mxu3  ;;  %v833_v5 = vmul.f32 -0.5, %v1168_v11  ;;  %v836_v29 = vand.u32 2147483647, %v1168_v11 }
 0x2a5   : > { %v823_v18 = vmul.f32 0.6931472, %v1170_v13  ;;  %1171 = vpow2.f32 %v709_v12  ;;  %v1592_v19 = vadd.f32 %v1431_v20, %v593_v17 }
 0x2a6   : > { %1173 = vlog2.f32 %v830_v15  ;;  %v834_v25 = vadd.f32 1.0, %v833_v5  ;;  %vm837_vm0 = vcmp.lt.f32.partialorder %v836_v29, 0.0004427343 }
 0x2a7   : > { %v829_v22 = vsel %vm828_vm14, %v826_v14, %v823_v18  ;;  %v664_v9 = vand.u32 2147483647, %v1592_v19  ;;  %v616_v60 = vmax.f32 %v1592_v19, 0.0  ;;  %vm632_vm6 = vcmp.ne.f32.partialorder %v1592_v19, %v1592_v19 }
 0x2a8   : > { %v869_v23 = vadd.f32 %v829_v22, %v613_v21  ;;  %v835_v36 = vmul.f32 %v1168_v11, %v834_v25 }
 0x2a9   : > { %v680_v26 = vsub.f32 0.0, %v664_v9 }
 0x2aa   : > { %v885_v27 = vsel %vm629_vm15, %v1556_v28, %v869_v23 }
 0x2ab   : > { %v1172_v30 = vpop.eup %1171  ;;  %v901_v20 = vsel %vm1450_vm5, %v885_v27, %v1556_v28  ;;  %v711_v16 = vmul.f32 1.442695, %v680_v26 }
 0x2ac   : > { %v1174_v31 = vpop.eup %1173  ;;  %917 = vst [vmem:[%s1456_s7 + $0x60] sm:$0xff] %v901_v20  ;;  %v839_v32 = vadd.f32 1.0, %v1172_v30  ;;  %v842_v39 = vmul.f32 -0.5, %v1172_v30  ;;  %v845_v43 = vand.u32 2147483647, %v1172_v30 }
 0x2ad   : > { %v832_v34 = vmul.f32 0.6931472, %v1174_v31  ;;  %1175 = vpow2.f32 %v711_v16 }
 0x2ae   : > { %1177 = vlog2.f32 %v839_v32  ;;  %v843_v42 = vadd.f32 1.0, %v842_v39  ;;  %vm846_vm2 = vcmp.lt.f32.partialorder %v845_v43, 0.0004427343 }
 0x2af   : > { %v838_v24 = vsel %vm837_vm0, %v835_v36, %v832_v34 }
 0x2b0   : > { %v870_v41 = vadd.f32 %v838_v24, %v614_v40  ;;  %v844_v35 = vmul.f32 %v1172_v30, %v843_v42 }
 0x2b2   : > { %v886_v28 = vsel %vm630_vm1, %v1568_v47, %v870_v41 }
 0x2b3   : > { %v1176_v44 = vpop.eup %1175  ;;  %v902_v45 = vsel %vm1450_vm5, %v886_v28, %v1568_v47 }
 0x2b4   : > { %v1178_v46 = vpop.eup %1177  ;;  %918 = vst [vmem:[%s1456_s7 + $0x68] sm:$0xff] %v902_v45  ;;  %v848_v38 = vadd.f32 1.0, %v1176_v44  ;;  %v851_v37 = vmul.f32 -0.5, %v1176_v44  ;;  %v854_v56 = vand.u32 2147483647, %v1176_v44 }
 0x2b5   : > { %v841_v48 = vmul.f32 0.6931472, %v1178_v46 }
 0x2b6   : > { %1179 = vlog2.f32 %v848_v38  ;;  %v852_v53 = vadd.f32 1.0, %v851_v37  ;;  %vm855_vm4 = vcmp.lt.f32.partialorder %v854_v56, 0.0004427343 }
 0x2b7   : > { %v847_v51 = vsel %vm846_vm2, %v844_v35, %v841_v48 }
 0x2b8   : > { %v871_v52 = vadd.f32 %v847_v51, %v615_v49  ;;  %v853_v59 = vmul.f32 %v1176_v44, %v852_v53 }
 0x2ba   : > { %v887_v47 = vsel %vm631_vm3, %v1580_v1, %v871_v52 }
 0x2bb   : > { %v903_v57 = vsel %vm1450_vm5, %v887_v47, %v1580_v1 }
 0x2bc   : > { %v1180_v33 = vpop.eup %1179  ;;  %919 = vst [vmem:[%s1456_s7 + $0x70] sm:$0xff] %v903_v57 }
 0x2bd   : > { %v850_v58 = vmul.f32 0.6931472, %v1180_v33 }
 0x2bf   : > { %v856_v61 = vsel %vm855_vm4, %v853_v59, %v850_v58 }
 0x2c0   : > { %v872_v63 = vadd.f32 %v856_v61, %v616_v60 }
 0x2c2   : > { %v888_v0 = vsel %vm632_vm6, %v1592_v19, %v872_v63 }
 0x2c3   : > { %v904_v50 = vsel %vm1450_vm5, %v888_v0, %v1592_v19 }
 0x2c4   : > { %920 = vst [vmem:[%s1456_s7 + $0x78] sm:$0xff] %v904_v50 }
 0x2c5   : > { %1238 = shalt.err (!%p1235_p8)
}
 0x2c6   : > { %s1282_s30 = smov 128   ;;  %s1283_s3 = smov 8  }
 0x2c7   : > { %1063 = dma.vmem_to_hbm [thread:$0]  (%p1337_p5), %s935_s13, 2048, %s937_s21, %s922_s22, %s1282_s30, %s1282_s30, %s1283_s3  }
 0x2c8 PF: > { %p1075_p9 = scmp.ge.s32.totalorder %s1277_s12, 2  ;;  %s951_s4 = sand.u32 1, %s1265_s9  }
 0x2c9   : > { %s952_s5 = scalar_lea.sflag [#allocation4], %s951_s4 }
 0x2ca   : > { %p1070_p10 = pnand %p1075_p9, %p1341_p6 }
 0x2cc   : > { %p1071_p11 = pneg %p1070_p10 }
 0x2ce   : > { %1260 = dma.done.wait (%p1071_p11), %s952_s5, 2048  }
 0x2cf   : > { %1262 = vsyncadd (%p1071_p11), %s952_s5, 4294965248  ;;  %p13_p12 = scmp.ge.s32.totalorder %s1324_s15, 4   ;;  %s1668_s9 = smov %s1269_s10 }
 0x2d0   : > { %s1669_s10 = smov %s1273_s11  ;;  %s1670_s11 = smov %s1335_s18 }
 0x2d1   : > { %s1671_s12 = smov %s1324_s15  ;;  %15 = sbr.rel (!%p13_p12) target bundleno = 4 (0x4), region = 68 }
 0x2d6   :  { %958 = vsyncpa [#allocation3], 1 }
 0x2d7   :  { %960 = vsyncpa [#allocation3 + $0x1], 1 }
 0x2d8   :  { %961 = vsyncpa [#allocation4], 1 }
 0x2d9   :  { %963 = vsyncpa [#allocation4 + $0x1], 1 }

</bundles_post_ra>
